<compile_context>
chip_gen: v5e
topology: v5e:2x2
jax: 0.10.0
libtpu: 0.0.40
codegen_flags: <defaults>
</compile_context>

<pallas_src>
import functools

import jax
import jax.numpy as jnp
from jax.experimental import pallas as pl
from jax.experimental.pallas import tpu as pltpu

IN_FEATURES = 384
OUT_FEATURES = 2
PADDED_OUT = 128  # lane-dense output width (one full lane group)


def _round_up(n, m):
    return ((n + m - 1) // m) * m


def _fc_sigmoid_kernel(x_ref, w_ref, b_ref, o_ref):
    # MXU matmul (f32 accumulate) on an aligned [TB, 128] result tile,
    # bias add on VPU, sigmoid (exp + recip) on EUP.
    z = jnp.dot(x_ref[...], w_ref[...], preferred_element_type=jnp.float32)
    z = z + b_ref[...]  # broadcast [1, 128] over [TB, 128]
    o_ref[...] = jax.nn.sigmoid(z).astype(o_ref.dtype)


def lstmnet_forward(x, w_t, b, *, block_b=1024):
    """x: [B, 384] f32, w_t: [384, 2] f32 (pre-transposed), b: [2] f32.

    Returns sigmoid(x @ w_t + b): [B, 2] f32.
    block_b: batch tile size (rows per grid step).  1024 rows of f32[384]
    double-buffered is ~3 MiB -> safely under scoped VMEM on v5e/v6e/v7x.
    """
    B = x.shape[0]

    # Pad weight/bias to a lane-dense [*, 128] result tile (zero columns).
    w_pad = jnp.zeros((IN_FEATURES, PADDED_OUT), x.dtype).at[:, :OUT_FEATURES].set(w_t)
    b_pad = jnp.zeros((1, PADDED_OUT), x.dtype).at[:, :OUT_FEATURES].set(
        b.reshape(1, OUT_FEATURES)
    )

    # Batch tile: multiple of 8 (f32 sublane), capped at block_b; pad B to a
    # multiple of the tile so every grid step sees a full (8,128)-legal block.
    tb = min(block_b, _round_up(B, 8))
    b_padded = _round_up(B, tb)
    if b_padded != B:
        x = jnp.pad(x, ((0, b_padded - B), (0, 0)))
    grid = (b_padded // tb,)

    out = pl.pallas_call(
        _fc_sigmoid_kernel,
        out_shape=jax.ShapeDtypeStruct((b_padded, PADDED_OUT), jnp.float32),
        grid_spec=pltpu.PrefetchScalarGridSpec(
            num_scalar_prefetch=0,
            grid=grid,
            in_specs=[
                # x: streamed per batch tile (the only real HBM traffic).
                pl.BlockSpec((tb, IN_FEATURES), lambda i: (i, 0)),
                # weight / bias: constant block index -> loaded once, resident.
                pl.BlockSpec((IN_FEATURES, PADDED_OUT), lambda i: (0, 0)),
                pl.BlockSpec((1, PADDED_OUT), lambda i: (0, 0)),
            ],
            out_specs=pl.BlockSpec((tb, PADDED_OUT), lambda i: (i, 0)),
        ),
        compiler_params=pltpu.CompilerParams(
            dimension_semantics=("parallel",),
        ),
        cost_estimate=pl.CostEstimate(
            flops=2 * b_padded * IN_FEATURES * PADDED_OUT,
            transcendentals=b_padded * PADDED_OUT,
            bytes_accessed=(
                b_padded * IN_FEATURES * 4          # read x
                + IN_FEATURES * PADDED_OUT * 4      # read w (once)
                + b_padded * PADDED_OUT * 4         # write out
            ),
        ),
    )(x, w_pad, b_pad)

    # Strip batch padding and the lane-padding columns.
    return out[:B, :OUT_FEATURES]


def init_params(key):
    # Mirror nn.Linear default init: U(-1/sqrt(in), 1/sqrt(in)).
    k_w, k_b = jax.random.split(key)
    bound = 1.0 / (IN_FEATURES ** 0.5)
    w = jax.random.uniform(
        k_w, (OUT_FEATURES, IN_FEATURES), jnp.float32, -bound, bound
    )
    b = jax.random.uniform(k_b, (OUT_FEATURES,), jnp.float32, -bound, bound)
    return w, b


if __name__ == "__main__":
    key = jax.random.PRNGKey(0)
    k_params, k_x1, k_x2 = jax.random.split(key, 3)

    w, b = init_params(k_params)   # w: [2, 384] (PyTorch layout), b: [2]
    w_t = w.T                      # pre-transposed for the kernel: [384, 2]

    # Case 1: small batch (single grid step).
    B1 = 8
    x1 = jax.random.normal(k_x1, (B1, IN_FEATURES), jnp.float32)
    out1 = jax.block_until_ready(lstmnet_forward(x1, w_t, b))
    ref1 = jax.nn.sigmoid(x1 @ w.T + b)
    assert out1.shape == (B1, OUT_FEATURES)
    assert jnp.allclose(out1, ref1, atol=1e-5, rtol=1e-5)

    # Case 2: ragged batch with a small tile to exercise the multi-step grid
    # and the batch-padding path.
    B2 = 100
    x2 = jax.random.normal(k_x2, (B2, IN_FEATURES), jnp.float32)
    out2 = jax.block_until_ready(
        functools.partial(lstmnet_forward, block_b=32)(x2, w_t, b)
    )
    ref2 = jax.nn.sigmoid(x2 @ w.T + b)
    assert out2.shape == (B2, OUT_FEATURES)
    assert jnp.allclose(out2, ref2, atol=1e-5, rtol=1e-5)

    print("KERNEL_OK")
</pallas_src>

<mosaic_0001>
module attributes {stable_mosaic.version = 11 : i64} {
  func.func @_fc_sigmoid_kernel(%arg0: i32, %arg1: memref<8x384xf32, #tpu.memory_space<vmem>>, %arg2: memref<384x128xf32, #tpu.memory_space<vmem>>, %arg3: memref<1x128xf32, #tpu.memory_space<vmem>>, %arg4: memref<8x128xf32, #tpu.memory_space<vmem>>) attributes {dimension_semantics = [#tpu.dimension_semantics<parallel>], iteration_bounds = array<i64: 1>, scalar_prefetch = 0 : i64, scratch_operands = 0 : i64, tpu.core_type = #tpu.core_type<tc>, window_params = [{transform_indices = @transform_0, window_bounds = array<i64: 8, 384>}, {pipeline_mode = #tpu.pipeline_mode<synchronous>, transform_indices = @transform_1, window_bounds = array<i64: 384, 128>}, {pipeline_mode = #tpu.pipeline_mode<synchronous>, transform_indices = @transform_2, window_bounds = array<i64: 1, 128>}, {transform_indices = @transform_3, window_bounds = array<i64: 8, 128>}]} {
    %c0 = arith.constant 0 : index
    %c0_0 = arith.constant 0 : index
    %0 = vector.load %arg1[%c0, %c0_0] : memref<8x384xf32, #tpu.memory_space<vmem>>, vector<8x384xf32>
    %c0_1 = arith.constant 0 : index
    %c0_2 = arith.constant 0 : index
    %1 = vector.load %arg2[%c0_1, %c0_2] : memref<384x128xf32, #tpu.memory_space<vmem>>, vector<384x128xf32>
    %cst = arith.constant dense<0.000000e+00> : vector<8x128xf32>
    %2 = tpu.matmul %0, %1, %cst {dimension_numbers = #tpu.dot_dimension_numbers<[1], [0], [0], [1], [0, 0, 1, 1], [], []>} : vector<8x384xf32>, vector<384x128xf32>, vector<8x128xf32> -> vector<8x128xf32>
    %c0_3 = arith.constant 0 : index
    %c0_4 = arith.constant 0 : index
    %3 = vector.load %arg3[%c0_3, %c0_4] : memref<1x128xf32, #tpu.memory_space<vmem>>, vector<1x128xf32>
    %4 = vector.broadcast %3 : vector<1x128xf32> to vector<8x128xf32>
    %5 = arith.addf %2, %4 : vector<8x128xf32>
    %6 = arith.negf %5 : vector<8x128xf32>
    %7 = math.exp %6 : vector<8x128xf32>
    %cst_5 = arith.constant 1.000000e+00 : f32
    %8 = vector.broadcast %cst_5 : f32 to vector<8x128xf32>
    %9 = arith.addf %8, %7 : vector<8x128xf32>
    %10 = arith.divf %8, %9 : vector<8x128xf32>
    %c0_6 = arith.constant 0 : index
    %c0_7 = arith.constant 0 : index
    %11 = vector.load %arg4[%c0_6, %c0_7] : memref<8x128xf32, #tpu.memory_space<vmem>>, vector<8x128xf32>
    tpu.vector_store %arg4[%c0_6, %c0_7], %10 {strides = array<i32>} : memref<8x128xf32, #tpu.memory_space<vmem>>, vector<8x128xf32>,
    return
  }
  func.func @transform_0(%arg0: i32) -> (i32, i32) {
    %c0_i32 = arith.constant 0 : i32
    %c0_i32_0 = arith.constant 0 : i32
    return %arg0, %c0_i32 : i32, i32
  }
  func.func @transform_1(%arg0: i32) -> (i32, i32) {
    %c0_i32 = arith.constant 0 : i32
    %c0_i32_0 = arith.constant 0 : i32
    %c0_i32_1 = arith.constant 0 : i32
    return %c0_i32, %c0_i32_0 : i32, i32
  }
  func.func @transform_2(%arg0: i32) -> (i32, i32) {
    %c0_i32 = arith.constant 0 : i32
    %c0_i32_0 = arith.constant 0 : i32
    %c0_i32_1 = arith.constant 0 : i32
    return %c0_i32, %c0_i32_0 : i32, i32
  }
  func.func @transform_3(%arg0: i32) -> (i32, i32) {
    %c0_i32 = arith.constant 0 : i32
    %c0_i32_0 = arith.constant 0 : i32
    return %arg0, %c0_i32 : i32, i32
  }
}

</mosaic_0001>

<bundles_post_ra>
// kernel: tpu_custom_call.1
= control target key start
LH: loop header
LB: loop body
LE: loop exit
PB: predicated region body
PF: predicated region fallthrough
CT: control target
= control target key end

     0   :  { %8 = vsyncpa [#allocation3], 0  ;;  %s324_s0 = inlined_call_operand.hbm [shape: f32[8,384], index: 0, kind: input, shape index: {}]   ;;  %s325_s1 = inlined_call_operand.hbm [shape: f32[384,128], index: 1, kind: input, shape index: {}]   ;;  %s326_s2 = inlined_call_operand.vmem [shape: f32[1,128], index: 2, kind: input, shape index: {}]   ;;  %s327_s3 = inlined_call_operand.hbm [shape: f32[8,128], index: 3, kind: output, shape index: {}]  }
   0x1   :  { %9 = vsyncpa [#allocation6], 0 }
   0x2   :  { %10 = vsyncpa [#allocation4], 0  ;;  %s16_s14 = sshll.u32 %s324_s0, 4  ;;  %s287_s15 = smov [#allocation2]   ;;  %s17_s14 = int_to_ptr.hbm [resolvable:$true] %s16_s14 }
   0x3   :  { %s18_s16 = sshll.u32 %s287_s15, 4  ;;  %s26_s19 = sshll.u32 %s325_s1, 4  ;;  %s19_s16 = int_to_ptr.vmem [resolvable:$true] %s18_s16  ;;  %s27_s19 = int_to_ptr.hbm [resolvable:$true] %s26_s19 }
   0x4   :  { %21 = dma.hbm_to_vmem [thread:$0]  %s17_s14, 384, %s19_s16, [#allocation3]  }
   0x5   :  { %s288_s20 = smov [#allocation5]   ;;  %s289_s22 = smov 128  }
   0x6   :  { %s28_s21 = sshll.u32 %s288_s20, 4  ;;  %s290_s23 = smov 8   ;;  %s29_s21 = int_to_ptr.vmem [resolvable:$true] %s28_s21 }
   0x7   :  { %34 = dma.hbm_to_vmem [thread:$0]  %s27_s19, 6144, %s29_s21, [#allocation6], %s289_s22, %s289_s22, %s290_s23  }
   0x8   :  { %281 = dma.done.wait [#allocation3], 384  }
   0x9   :  { %282 = vsyncadd [#allocation3], 4294966912 }
   0xa   :  { %283 = dma.done.wait [#allocation6], 6144  }
   0xb   :  { %284 = vsyncadd [#allocation6], 4294961152  ;;  %v95_v0 = vld [vmem:[#allocation5 + $0x178] sm:$0xff]  ;;  %v94_v2 = vld [vmem:[#allocation5 + $0x170] sm:$0xff]  ;;  %s291_s24 = smov [#allocation7]   ;;  %s187_s27 = sshll.u32 %s327_s3, 4  ;;  %s188_s27 = int_to_ptr.hbm [resolvable:$true] %s187_s27 }
   0xc   :  { %v63_v1 = vld [vmem:[#allocation5 + $0x78] sm:$0xff]  ;;  %140 = vmatpush.msra.mxu2 %v95_v0  ;;  %v62_v3 = vld [vmem:[#allocation5 + $0x70] sm:$0xff]  ;;  %v93_v5 = vld [vmem:[#allocation5 + $0x168] sm:$0xff] }
   0xd   :  { %100 = vmatpush.msra.mxu0 %v63_v1  ;;  %v79_v4 = vld [vmem:[#allocation5 + $0xf8] sm:$0xff]  ;;  %v61_v6 = vld [vmem:[#allocation5 + $0x68] sm:$0xff]  ;;  %v78_v7 = vld [vmem:[#allocation5 + $0xf0] sm:$0xff] }
   0xe   :  { %120 = vmatpush.msra.mxu1 %v79_v4  ;;  %141 = vmatpush.msra.mxu2 %v94_v2  ;;  %v77_v8 = vld [vmem:[#allocation5 + $0xe8] sm:$0xff]  ;;  %v92_v9 = vld [vmem:[#allocation5 + $0x160] sm:$0xff]  ;;  %v91_v12 = vld [vmem:[#allocation5 + $0x158] sm:$0xff] }
   0xf   :  { %101 = vmatpush.msra.mxu0 %v62_v3  ;;  %v60_v10 = vld [vmem:[#allocation5 + $0x60] sm:$0xff]  ;;  %v59_v13 = vld [vmem:[#allocation5 + $0x58] sm:$0xff]  ;;  %v90_v15 = vld [vmem:[#allocation5 + $0x150] sm:$0xff] }
  0x10   :  { %121 = vmatpush.msra.mxu1 %v78_v7  ;;  %142 = vmatpush.msra.mxu2 %v93_v5  ;;  %v76_v11 = vld [vmem:[#allocation5 + $0xe0] sm:$0xff]  ;;  %v75_v14 = vld [vmem:[#allocation5 + $0xd8] sm:$0xff]  ;;  %v58_v16 = vld [vmem:[#allocation5 + $0x50] sm:$0xff] }
  0x11   :  { %102 = vmatpush.msra.mxu0 %v61_v6  ;;  %v74_v17 = vld [vmem:[#allocation5 + $0xd0] sm:$0xff]  ;;  %v89_v18 = vld [vmem:[#allocation5 + $0x148] sm:$0xff]  ;;  %v88_v21 = vld [vmem:[#allocation5 + $0x140] sm:$0xff] }
  0x12   :  { %122 = vmatpush.msra.mxu1 %v77_v8  ;;  %143 = vmatpush.msra.mxu2 %v92_v9  ;;  %v57_v19 = vld [vmem:[#allocation5 + $0x48] sm:$0xff]  ;;  %v56_v22 = vld [vmem:[#allocation5 + $0x40] sm:$0xff]  ;;  %v87_v24 = vld [vmem:[#allocation5 + $0x138] sm:$0xff] }
  0x13   :  { %103 = vmatpush.msra.mxu0 %v60_v10  ;;  %v73_v20 = vld [vmem:[#allocation5 + $0xc8] sm:$0xff]  ;;  %v72_v23 = vld [vmem:[#allocation5 + $0xc0] sm:$0xff]  ;;  %v55_v25 = vld [vmem:[#allocation5 + $0x38] sm:$0xff] }
  0x14   :  { %123 = vmatpush.msra.mxu1 %v76_v11  ;;  %144 = vmatpush.msra.mxu2 %v91_v12  ;;  %v71_v26 = vld [vmem:[#allocation5 + $0xb8] sm:$0xff]  ;;  %v86_v27 = vld [vmem:[#allocation5 + $0x130] sm:$0xff]  ;;  %v85_v30 = vld [vmem:[#allocation5 + $0x128] sm:$0xff] }
  0x15   :  { %104 = vmatpush.msra.mxu0 %v59_v13  ;;  %v54_v28 = vld [vmem:[#allocation5 + $0x30] sm:$0xff]  ;;  %v53_v31 = vld [vmem:[#allocation5 + $0x28] sm:$0xff]  ;;  %v84_v33 = vld [vmem:[#allocation5 + $0x120] sm:$0xff] }
  0x16   :  { %124 = vmatpush.msra.mxu1 %v75_v14  ;;  %145 = vmatpush.msra.mxu2 %v90_v15  ;;  %v70_v29 = vld [vmem:[#allocation5 + $0xb0] sm:$0xff]  ;;  %v69_v32 = vld [vmem:[#allocation5 + $0xa8] sm:$0xff]  ;;  %v52_v34 = vld [vmem:[#allocation5 + $0x20] sm:$0xff] }
  0x17   :  { %105 = vmatpush.msra.mxu0 %v58_v16  ;;  %v68_v35 = vld [vmem:[#allocation5 + $0xa0] sm:$0xff]  ;;  %v83_v36 = vld [vmem:[#allocation5 + $0x118] sm:$0xff]  ;;  %v82_v39 = vld [vmem:[#allocation5 + $0x110] sm:$0xff] }
  0x18   :  { %125 = vmatpush.msra.mxu1 %v74_v17  ;;  %146 = vmatpush.msra.mxu2 %v89_v18  ;;  %v51_v37 = vld [vmem:[#allocation5 + $0x18] sm:$0xff]  ;;  %v50_v40 = vld [vmem:[#allocation5 + $0x10] sm:$0xff]  ;;  %v81_v42 = vld [vmem:[#allocation5 + $0x108] sm:$0xff] }
  0x19   :  { %106 = vmatpush.msra.mxu0 %v57_v19  ;;  %v67_v38 = vld [vmem:[#allocation5 + $0x98] sm:$0xff]  ;;  %v66_v41 = vld [vmem:[#allocation5 + $0x90] sm:$0xff]  ;;  %v49_v43 = vld [vmem:[#allocation5 + $0x8] sm:$0xff] }
  0x1a   :  { %126 = vmatpush.msra.mxu1 %v73_v20  ;;  %147 = vmatpush.msra.mxu2 %v88_v21  ;;  %v65_v44 = vld [vmem:[#allocation5 + $0x88] sm:$0xff]  ;;  %v80_v45 = vld [vmem:[#allocation5 + $0x100] sm:$0xff]  ;;  %v47_v47 = vld [vmem:[#allocation2 + $0x10] sm:$0xff] }
  0x1b   :  { %107 = vmatpush.msra.mxu0 %v56_v22  ;;  %v48_v46 = vld [vmem:[#allocation5] sm:$0xff]  ;;  %v45_v48 = vld [vmem:[#allocation2] sm:$0xff]  ;;  %v46_v50 = vld [vmem:[#allocation2 + $0x8] sm:$0xff] }
  0x1c   :  { %127 = vmatpush.msra.mxu1 %v72_v23  ;;  %148 = vmatpush.msra.mxu2 %v87_v24  ;;  %v64_v49 = vld [vmem:[#allocation5 + $0x80] sm:$0xff]  ;;  %v204_v51 = vld [vmem:[%s326_s2] ss:$0 sm:$0xff]  ;;  %s185_s2 = sshll.u32 %s291_s24, 4  ;;  %s186_s2 = int_to_ptr.vmem [resolvable:$true] %s185_s2 }
  0x1d   :  { %108 = vmatpush.msra.mxu0 %v55_v25 }
  0x1e   :  { %128 = vmatpush.msra.mxu1 %v71_v26  ;;  %149 = vmatpush.msra.mxu2 %v86_v27 }
  0x1f   :  { %109 = vmatpush.msra.mxu0 %v54_v28 }
  0x20   :  { %129 = vmatpush.msra.mxu1 %v70_v29  ;;  %150 = vmatpush.msra.mxu2 %v85_v30 }
  0x21   :  { %110 = vmatpush.msra.mxu0 %v53_v31 }
  0x22   :  { %130 = vmatpush.msra.mxu1 %v69_v32  ;;  %151 = vmatpush.msra.mxu2 %v84_v33 }
  0x23   :  { %111 = vmatpush.msra.mxu0 %v52_v34 }
  0x24   :  { %131 = vmatpush.msra.mxu1 %v68_v35  ;;  %152 = vmatpush.msra.mxu2 %v83_v36 }
  0x25   :  { %112 = vmatpush.msra.mxu0 %v51_v37 }
  0x26   :  { %132 = vmatpush.msra.mxu1 %v67_v38  ;;  %153 = vmatpush.msra.mxu2 %v82_v39 }
  0x27   :  { %113 = vmatpush.msra.mxu0 %v50_v40 }
  0x28   :  { %133 = vmatpush.msra.mxu1 %v66_v41  ;;  %154 = vmatpush.msra.mxu2 %v81_v42 }
  0x29   :  { %114 = vmatpush.msra.mxu0 %v49_v43 }
  0x2a   :  { %134 = vmatpush.msra.mxu1 %v65_v44  ;;  %155 = vmatpush.msra.mxu2 %v80_v45 }
  0x2b   :  { %115 = vmatpush.msra.mxu0 %v48_v46  ;;  %156 = vmatmul.f32.vlgmr.msra.gmra.mxu2 %v47_v47 }
  0x2c   :  { %116 = vmatmul.f32.vlgmr.msra.gmra.mxu0 %v45_v48  ;;  %135 = vmatpush.msra.mxu1 %v64_v49 }
  0x2d   :  { %136 = vmatmul.f32.vlgmr.msra.gmra.mxu1 %v46_v50 }
  0xa9   :  { %v117_v52 = vpop.f32.mrf.mxu0 }
  0xaa   :  { %v118_v53 = vadd.f32 %v204_v51, %v117_v52  ;;  %v137_v54 = vpop.f32.mrf.mxu1 }
  0xac   :  { %v138_v55 = vadd.f32 %v137_v54, %v118_v53 }
  0xae   :  { %v157_v56 = vpop.f32.mrf.mxu2 }
  0xaf   :  { %v158_v57 = vadd.f32 %v157_v56, %v138_v55 }
  0xb1   :  { %v198_v58 = vmul.f32 -1.442695, %v158_v57 }
  0xb3   :  { %205 = vpow2.f32 %v198_v58 }
  0xb9   :  { %v206_v59 = vpop.eup %205 }
  0xba   :  { %v163_v60 = vadd.f32 1.0, %v206_v59 }
  0xbc   :  { %207 = vrcp.f32 %v163_v60  ;;  %v175_v0 = vand.u32 2147483648, %v163_v60  ;;  %v173_v2 = vand.u32 2147483647, %v163_v60  ;;  %vm169_vm1 = vweird.f32 %v163_v60 }
  0xbe   :  { %v176_v4 = vor.u32 1.1754944e-38, %v175_v0  ;;  %vm174_vm3 = vcmp.eq.f32.partialorder %v173_v2, 8.507059e+37 }
  0xc2   :  { %v208_v61 = vpop.eup %207 }
  0xc3   :  { %v165_v62 = vmul.f32 %v208_v61, %v163_v60  ;;  %vm170_vm0 = vweird.f32 %v208_v61 }
  0xc4   :  { %vm171_vm2 = vmor %vm169_vm1, %vm170_vm0 }
  0xc5   :  { %v166_v63 = vsub.f32 1.0, %v165_v62 }
  0xc7   :  { %v167_v1 = vmul.f32 %v208_v61, %v166_v63 }
  0xc9   :  { %v168_v3 = vadd.f32 %v208_v61, %v167_v1 }
  0xcb   :  { %v172_v5 = vsel %vm171_vm2, %v208_v61, %v168_v3 }
  0xcc   :  { %v177_v6 = vsel %vm174_vm3, %v176_v4, %v172_v5 }
  0xcd   :  { %179 = vst [vmem:[#allocation7] sm:$0xff] %v177_v6 }
  0xce   :  { %190 = dma.vmem_to_hbm [thread:$0]  %s186_s2, 128, %s188_s27, [#allocation4]  }
  0xcf   :  { %285 = dma.done.wait [#allocation4], 128  }
  0xd0   :  { %286 = vsyncadd [#allocation4], 4294967168 }
  0xd1   :  { %195 = vsyncpa [#allocation3], 1 }
  0xd2   :  { %196 = vsyncpa [#allocation6], 1 }
  0xd3   :  { %197 = vsyncpa [#allocation4], 1 }

</bundles_post_ra>
